<compile_context>
chip_gen: v6e
topology: v6e:2x2x1
jax: 0.10.0
libtpu: 0.0.40
codegen_flags: <defaults>
</compile_context>

<pallas_src>
import jax
import jax.numpy as jnp
from jax.experimental import pallas as pl
from jax.experimental.pallas import tpu as pltpu


def _round_up(x: int, m: int) -> int:
    return ((x + m - 1) // m) * m


def _cdiv(a: int, b: int) -> int:
    return (a + b - 1) // b


def _sublane_multiple(dtype) -> int:
    # Sub-32-bit dtypes pack along sublanes: bf16 -> 16 rows/vreg, int8 -> 32.
    return {4: 8, 2: 16, 1: 32}.get(jnp.dtype(dtype).itemsize, 8)


# ---------------------------------------------------------------------------
# Kernel: one batch tile of   out = relu(x @ W1 + b1) @ W2 + b2
# ---------------------------------------------------------------------------
def _mlp_kernel(x_ref, w1_ref, b1_ref, w2_ref, b2_ref, o_ref):
    # Cast x to the weight dtype so bf16 weights take the native bf16 MXU path
    # (no-op when both are f32); accumulate in f32 on the MXU.
    x = x_ref[...].astype(w1_ref.dtype)
    h = jnp.dot(x, w1_ref[...], preferred_element_type=jnp.float32)
    h = jnp.maximum(h + b1_ref[...], 0.0)            # bias + ReLU fused (VPU)
    y = jnp.dot(h.astype(w2_ref.dtype), w2_ref[...],
                preferred_element_type=jnp.float32)
    o_ref[...] = (y + b2_ref[...]).astype(o_ref.dtype)


# ---------------------------------------------------------------------------
# One-time capability probe: single-buffered (pl.Buffered(1)) constant-index
# weight blocks.  Falls back to default double buffering if unsupported.
# ---------------------------------------------------------------------------
_WEIGHT_SPEC_KW = None


def _probe_kernel(x_ref, o_ref):
    o_ref[...] = x_ref[...] + 1.0


def _resolve_weight_spec_kwargs():
    global _WEIGHT_SPEC_KW
    if _WEIGHT_SPEC_KW is None:
        try:
            kw = dict(pipeline_mode=pl.Buffered(1))
            probe = pl.pallas_call(
                _probe_kernel,
                out_shape=jax.ShapeDtypeStruct((16, 128), jnp.float32),
                grid=(2,),
                in_specs=[pl.BlockSpec((8, 128), lambda i: (0, 0), **kw)],
                out_specs=pl.BlockSpec((8, 128), lambda i: (i, 0)),
                compiler_params=pltpu.CompilerParams(
                    dimension_semantics=("parallel",)),
            )
            jax.block_until_ready(probe(jnp.zeros((8, 128), jnp.float32)))
            _WEIGHT_SPEC_KW = kw          # supported: single-buffer the weights
        except Exception:
            _WEIGHT_SPEC_KW = {}          # fall back to default double buffering
    return _WEIGHT_SPEC_KW


# ---------------------------------------------------------------------------
# VMEM budgeting (generation-aware)
# ---------------------------------------------------------------------------
def _vmem_cap_bytes() -> int:
    # ~85% of physical VMEM: ~108 MiB on 128 MiB parts (v5e/v6e), ~54 MiB on
    # v7x's 64 MiB, leaving Mosaic internal-scratch headroom.
    try:
        return int(pltpu.get_tpu_info().vmem_capacity_bytes * 0.85)
    except Exception:
        return 64 << 20


def _vmem_limit_bytes(TB, F, H_pad, O_pad, w_itemsize, x_itemsize,
                      weight_buffers, cap) -> int:
    resident = weight_buffers * (F * H_pad + H_pad + H_pad * O_pad + O_pad) * w_itemsize
    streamed = 2 * TB * (F + O_pad) * x_itemsize      # double-buffered x / out tiles
    interm = TB * (H_pad + O_pad) * 4                 # f32 intermediates in the body
    needed = 2 * (resident + streamed + interm)       # 2x headroom
    return int(min(max(needed, 4 << 20), cap))


# ---------------------------------------------------------------------------
# Wrapper factory: pad the weights ONCE, return a jitted forward(x)
# ---------------------------------------------------------------------------
def make_net_forward(w1, b1, w2, b2, *, max_batch_tile=1024, lane=128):
    """w1: (F, H)  b1: (H,)  w2: (H, O)  b2: (O,)   ->   forward(x: (B, F)) -> (B, O)

    Weights are PyTorch-Linear weights stored transposed as (in, out).  All
    padding / reshaping of parameters happens here, out of the per-call path.
    """
    F, H = w1.shape
    H2, O = w2.shape
    assert H2 == H and b1.shape == (H,) and b2.shape == (O,)

    # Lane padding only for hidden / output dims; F (and the batch) stay
    # unpadded.  128 is optimal on v5e; use lane=256 for compute-bound
    # (large-H) configs on v6e/v7x whose MXUs are 256 wide.
    H_pad = _round_up(H, lane)
    O_pad = _round_up(O, lane)

    w1_p = jnp.pad(w1, ((0, 0), (0, H_pad - H)))
    b1_p = jnp.pad(b1, ((0, H_pad - H),)).reshape(1, H_pad)
    w2_p = jnp.pad(w2, ((0, H_pad - H), (0, O_pad - O)))
    b2_p = jnp.pad(b2, ((0, O_pad - O),)).reshape(1, O_pad)

    weight_kw = _resolve_weight_spec_kwargs()
    weight_buffers = 1 if weight_kw else 2
    w_itemsize = jnp.dtype(w1.dtype).itemsize
    vmem_cap = _vmem_cap_bytes()

    @jax.jit
    def forward(x):
        B, Fx = x.shape
        assert Fx == F, "feature dim mismatch"
        sub = _sublane_multiple(x.dtype)

        # Batch tiling: no materialized batch padding (edge tile writes are
        # masked by Pallas).  Use >=2 tiles whenever B allows so both of
        # v7x's TensorCores get work on the "parallel" batch axis.
        num_tiles = max(_cdiv(B, max_batch_tile), 2 if B >= 2 * sub else 1)
        TB = _round_up(_cdiv(B, num_tiles), sub)
        grid = (_cdiv(B, TB),)

        x_itemsize = jnp.dtype(x.dtype).itemsize
        vmem_bytes = _vmem_limit_bytes(TB, F, H_pad, O_pad, w_itemsize,
                                       x_itemsize, weight_buffers, vmem_cap)
        # TODO(synk): add a K-tiled (F/H grid axis + f32 accumulator scratch)
        # variant for weights too large to stay VMEM-resident under this budget.

        cost = pl.CostEstimate(
            flops=2 * B * (F * H_pad + H_pad * O_pad),
            transcendentals=0,
            bytes_accessed=(B * F * x_itemsize
                            + (F * H_pad + H_pad + H_pad * O_pad + O_pad) * w_itemsize
                            + B * O_pad * x_itemsize),
        )

        out_p = pl.pallas_call(
            _mlp_kernel,
            out_shape=jax.ShapeDtypeStruct((B, O_pad), x.dtype),
            grid_spec=pltpu.PrefetchScalarGridSpec(
                num_scalar_prefetch=0,
                grid=grid,
                in_specs=[
                    # x streams per batch tile; F left at full (unpadded) extent.
                    pl.BlockSpec((TB, F), lambda i: (i, 0)),
                    # Weights / biases: constant index_map -> VMEM-resident
                    # across the whole grid (single-buffered when supported).
                    pl.BlockSpec((F, H_pad), lambda i: (0, 0), **weight_kw),
                    pl.BlockSpec((1, H_pad), lambda i: (0, 0), **weight_kw),
                    pl.BlockSpec((H_pad, O_pad), lambda i: (0, 0), **weight_kw),
                    pl.BlockSpec((1, O_pad), lambda i: (0, 0), **weight_kw),
                ],
                out_specs=pl.BlockSpec((TB, O_pad), lambda i: (i, 0)),
            ),
            compiler_params=pltpu.CompilerParams(
                dimension_semantics=("parallel",),   # megacore-shardable on v7x
                vmem_limit_bytes=vmem_bytes,
            ),
            cost_estimate=cost,
        )(x, w1_p, b1_p, w2_p, b2_p)

        return out_p if O_pad == O else out_p[:, :O]

    return forward


def init_params(key, n_feature, n_hidden, n_output, dtype=jnp.float32):
    """Deterministic init mimicking torch.nn.Linear (uniform +-1/sqrt(fan_in)).
    Weights are stored transposed relative to PyTorch: (in, out)."""
    k1, k2, k3, k4 = jax.random.split(key, 4)
    bound1 = 1.0 / (n_feature ** 0.5)
    bound2 = 1.0 / (n_hidden ** 0.5)
    w1 = jax.random.uniform(k1, (n_feature, n_hidden), dtype, -bound1, bound1)
    b1 = jax.random.uniform(k2, (n_hidden,), dtype, -bound1, bound1)
    w2 = jax.random.uniform(k3, (n_hidden, n_output), dtype, -bound2, bound2)
    b2 = jax.random.uniform(k4, (n_output,), dtype, -bound2, bound2)
    return w1, b1, w2, b2


if __name__ == "__main__":
    # Small shapes consistent with the module's forward: x is (batch, n_feature).
    batch, n_feature, n_hidden, n_output = 8, 32, 64, 16

    key = jax.random.PRNGKey(0)
    kx, kp = jax.random.split(key)
    x = jax.random.normal(kx, (batch, n_feature), jnp.float32)
    w1, b1, w2, b2 = init_params(kp, n_feature, n_hidden, n_output)

    forward = make_net_forward(w1, b1, w2, b2)
    out = jax.block_until_ready(forward(x))

    # Pure-JAX reference check of the forward semantics.
    ref = jnp.maximum(x @ w1 + b1, 0.0) @ w2 + b2
    assert out.shape == (batch, n_output)
    assert jnp.allclose(out, ref, atol=1e-5, rtol=1e-5), \
        f"max abs err = {jnp.max(jnp.abs(out - ref))}"

    print("KERNEL_OK")
</pallas_src>

<mosaic_0001>
module attributes {stable_mosaic.version = 11 : i64} {
  func.func @_probe_kernel(%arg0: i32, %arg1: memref<8x128xf32, #tpu.memory_space<vmem>>, %arg2: memref<8x128xf32, #tpu.memory_space<vmem>>) attributes {dimension_semantics = [#tpu.dimension_semantics<parallel>], iteration_bounds = array<i64: 2>, scalar_prefetch = 0 : i64, scratch_operands = 0 : i64, tpu.core_type = #tpu.core_type<tc>, window_params = [{pipeline_mode = #tpu.pipeline_mode<synchronous>, transform_indices = @transform_0, window_bounds = array<i64: 8, 128>}, {transform_indices = @transform_1, window_bounds = array<i64: 8, 128>}]} {
    %c0 = arith.constant 0 : index
    %c0_0 = arith.constant 0 : index
    %0 = vector.load %arg1[%c0, %c0_0] : memref<8x128xf32, #tpu.memory_space<vmem>>, vector<8x128xf32>
    %cst = arith.constant 1.000000e+00 : f32
    %1 = vector.broadcast %cst : f32 to vector<8x128xf32>
    %2 = arith.addf %0, %1 : vector<8x128xf32>
    %c0_1 = arith.constant 0 : index
    %c0_2 = arith.constant 0 : index
    %3 = vector.load %arg2[%c0_1, %c0_2] : memref<8x128xf32, #tpu.memory_space<vmem>>, vector<8x128xf32>
    tpu.vector_store %arg2[%c0_1, %c0_2], %2 {strides = array<i32>} : memref<8x128xf32, #tpu.memory_space<vmem>>, vector<8x128xf32>,
    return
  }
  func.func @transform_0(%arg0: i32) -> (i32, i32) {
    %c0_i32 = arith.constant 0 : i32
    %c0_i32_0 = arith.constant 0 : i32
    %c0_i32_1 = arith.constant 0 : i32
    return %c0_i32, %c0_i32_0 : i32, i32
  }
  func.func @transform_1(%arg0: i32) -> (i32, i32) {
    %c0_i32 = arith.constant 0 : i32
    %c0_i32_0 = arith.constant 0 : i32
    return %arg0, %c0_i32 : i32, i32
  }
}

module attributes {stable_mosaic.version = 11 : i64} {
  func.func @_mlp_kernel(%arg0: i32, %arg1: memref<8x32xf32, #tpu.memory_space<vmem>>, %arg2: memref<32x128xf32, #tpu.memory_space<vmem>>, %arg3: memref<1x128xf32, #tpu.memory_space<vmem>>, %arg4: memref<128x128xf32, #tpu.memory_space<vmem>>, %arg5: memref<1x128xf32, #tpu.memory_space<vmem>>, %arg6: memref<8x128xf32, #tpu.memory_space<vmem>>) attributes {dimension_semantics = [#tpu.dimension_semantics<parallel>], iteration_bounds = array<i64: 1>, scalar_prefetch = 0 : i64, scratch_operands = 0 : i64, tpu.core_type = #tpu.core_type<tc>, window_params = [{transform_indices = @transform_0, window_bounds = array<i64: 8, 32>}, {pipeline_mode = #tpu.pipeline_mode<synchronous>, transform_indices = @transform_1, window_bounds = array<i64: 32, 128>}, {pipeline_mode = #tpu.pipeline_mode<synchronous>, transform_indices = @transform_2, window_bounds = array<i64: 1, 128>}, {pipeline_mode = #tpu.pipeline_mode<synchronous>, transform_indices = @transform_3, window_bounds = array<i64: 128, 128>}, {pipeline_mode = #tpu.pipeline_mode<synchronous>, transform_indices = @transform_4, window_bounds = array<i64: 1, 128>}, {transform_indices = @transform_5, window_bounds = array<i64: 8, 128>}]} {
    %c0 = arith.constant 0 : index
    %c0_0 = arith.constant 0 : index
    %0 = vector.load %arg1[%c0, %c0_0] : memref<8x32xf32, #tpu.memory_space<vmem>>, vector<8x32xf32>
    %c0_1 = arith.constant 0 : index
    %c0_2 = arith.constant 0 : index
    %1 = vector.load %arg2[%c0_1, %c0_2] : memref<32x128xf32, #tpu.memory_space<vmem>>, vector<32x128xf32>
    %cst = arith.constant dense<0.000000e+00> : vector<8x128xf32>
    %2 = tpu.matmul %0, %1, %cst {dimension_numbers = #tpu.dot_dimension_numbers<[1], [0], [0], [1], [0, 0, 1, 1], [], []>} : vector<8x32xf32>, vector<32x128xf32>, vector<8x128xf32> -> vector<8x128xf32>
    %c0_3 = arith.constant 0 : index
    %c0_4 = arith.constant 0 : index
    %3 = vector.load %arg3[%c0_3, %c0_4] : memref<1x128xf32, #tpu.memory_space<vmem>>, vector<1x128xf32>
    %4 = vector.broadcast %3 : vector<1x128xf32> to vector<8x128xf32>
    %5 = arith.addf %2, %4 : vector<8x128xf32>
    %cst_5 = arith.constant 0.000000e+00 : f32
    %6 = vector.broadcast %cst_5 : f32 to vector<8x128xf32>
    %7 = arith.maximumf %5, %6 : vector<8x128xf32>
    %c0_6 = arith.constant 0 : index
    %c0_7 = arith.constant 0 : index
    %8 = vector.load %arg4[%c0_6, %c0_7] : memref<128x128xf32, #tpu.memory_space<vmem>>, vector<128x128xf32>
    %cst_8 = arith.constant dense<0.000000e+00> : vector<8x128xf32>
    %9 = tpu.matmul %7, %8, %cst_8 {dimension_numbers = #tpu.dot_dimension_numbers<[1], [0], [0], [1], [0, 0, 1, 1], [], []>} : vector<8x128xf32>, vector<128x128xf32>, vector<8x128xf32> -> vector<8x128xf32>
    %c0_9 = arith.constant 0 : index
    %c0_10 = arith.constant 0 : index
    %10 = vector.load %arg5[%c0_9, %c0_10] : memref<1x128xf32, #tpu.memory_space<vmem>>, vector<1x128xf32>
    %11 = vector.broadcast %10 : vector<1x128xf32> to vector<8x128xf32>
    %12 = arith.addf %9, %11 : vector<8x128xf32>
    %c0_11 = arith.constant 0 : index
    %c0_12 = arith.constant 0 : index
    %13 = vector.load %arg6[%c0_11, %c0_12] : memref<8x128xf32, #tpu.memory_space<vmem>>, vector<8x128xf32>
    tpu.vector_store %arg6[%c0_11, %c0_12], %12 {strides = array<i32>} : memref<8x128xf32, #tpu.memory_space<vmem>>, vector<8x128xf32>,
    return
  }
  func.func @transform_0(%arg0: i32) -> (i32, i32) {
    %c0_i32 = arith.constant 0 : i32
    %c0_i32_0 = arith.constant 0 : i32
    return %arg0, %c0_i32 : i32, i32
  }
  func.func @transform_1(%arg0: i32) -> (i32, i32) {
    %c0_i32 = arith.constant 0 : i32
    %c0_i32_0 = arith.constant 0 : i32
    %c0_i32_1 = arith.constant 0 : i32
    return %c0_i32, %c0_i32_0 : i32, i32
  }
  func.func @transform_2(%arg0: i32) -> (i32, i32) {
    %c0_i32 = arith.constant 0 : i32
    %c0_i32_0 = arith.constant 0 : i32
    %c0_i32_1 = arith.constant 0 : i32
    return %c0_i32, %c0_i32_0 : i32, i32
  }
  func.func @transform_3(%arg0: i32) -> (i32, i32) {
    %c0_i32 = arith.constant 0 : i32
    %c0_i32_0 = arith.constant 0 : i32
    %c0_i32_1 = arith.constant 0 : i32
    return %c0_i32, %c0_i32_0 : i32, i32
  }
  func.func @transform_4(%arg0: i32) -> (i32, i32) {
    %c0_i32 = arith.constant 0 : i32
    %c0_i32_0 = arith.constant 0 : i32
    %c0_i32_1 = arith.constant 0 : i32
    return %c0_i32, %c0_i32_0 : i32, i32
  }
  func.func @transform_5(%arg0: i32) -> (i32, i32) {
    %c0_i32 = arith.constant 0 : i32
    %c0_i32_0 = arith.constant 0 : i32
    return %arg0, %c0_i32 : i32, i32
  }
}

</mosaic_0001>

<bundles_post_ra>
// kernel: tpu_custom_call.1
= control target key start
LH: loop header
LB: loop body
LE: loop exit
PB: predicated region body
PF: predicated region fallthrough
CT: control target
= control target key end

     0   :  { %6 = vsyncpa [#allocation3], 0  ;;  %s448_s0 = inlined_call_operand.hbm [shape: f32[8,128], index: 0, kind: input, shape index: {}]   ;;  %s449_s1 = inlined_call_operand.hbm [shape: f32[16,128], index: 1, kind: output, shape index: {}]  }
   0x1   :  { %7 = vsyncpa [#allocation4], 0 }
   0x2   :  { %9 = vsyncpa [#allocation4 + $0x1], 0  ;;  %s348_s6 = smov 0   ;;  %s350_s7 = smov 0  }
   0x3   :  { %s352_s8 = smov 0   ;;  %s354_s9 = smov 0  }
   0x4 LB: > { %s369_s10 = sadd.s32 4294967295, %s334_s9   ;;  %s184_s11 = sadd.s32 4294967294, %s334_s9   ;;  %s334_s9 = sphi %s354_s9, %s457_s9   ;;  %s330_s8 = sphi %s352_s8, %s456_s8   ;;  %s326_s7 = sphi %s350_s7, %s455_s7   ;;  %s322_s6 = sphi %s348_s6, %s454_s6  }
   0x5   : > { %s373_s12 = sadd.s32 1, %s334_s9   ;;  %s43_s13 = sadd.s32 1, %s330_s8 }
   0x6   : > { %s40_s14 = ssub.s32 %s334_s9, %s373_s12  ;;  %p53_p0 = scmp.ne.s32.totalorder %s330_s8, %s326_s7 }
   0x7   : > { %p41_p1 = scmp.eq.s32.totalorder %s40_s14, 0  ;;  %p54_p2 = scmp.eq.s32.totalorder %s369_s10, 1 }
   0x8   : > { %p59_p3 = scmp.ne.s32.totalorder %s326_s7, %s322_s6  ;;  %p60_p4 = scmp.eq.s32.totalorder %s184_s11, 1 }
   0x9   : > { %s384_s15 = scalar_select %p41_p1, %s330_s8, %s43_s13  }
   0xa   : > { %p386_p5 = por %p54_p2, %p53_p0  ;;  %p390_p6 = por %p60_p4, %p59_p3 }
   0xb   : > { %p185_p7 = scmp.ge.s32.totalorder %s334_s9, 1  ;;  %p67_p8 = scmp.lt.s32.totalorder %s334_s9, 3 }
   0xc   : > { %s451_s17 = scalar_select %p390_p6, 1, 0 }
   0xd   : > { %p208_p9 = scmp.eq.s32.totalorder %s369_s10, 0  ;;  %p397_p10 = pnand %p185_p7, %p67_p8 }
   0xe   : > { %s336_s19 = smov [#allocation2]  }
   0xf   : > { %s80_s20 = sshll.u32 %s336_s19, 4  ;;  %p200_p11 = pneg %p397_p10  ;;  %s81_s20 = int_to_ptr.vmem [resolvable:$true] %s80_s20 }
  0x10   : > { %s255_s21 = scalar_lea.vmem %s81_s20, 128  ;;  %p263_p3 = scmp.lt.s32.totalorder %s81_s20, %s81_s20 }
  0x11   : > { %p201_p12 = pnand %p208_p9, %p200_p11  ;;  %p256_p0 = scmp.ne.s32.totalorder %s81_s20, %s255_s21 }
  0x12   : > { %p264_p4 = scmp.lt.s32.totalorder %s255_s21, %s255_s21 }
  0x13   : > { %p246_p13 = pneg %p201_p12 }
  0x14   : > { %p265_p6 = por %p264_p4, %p263_p3 }
  0x15   : > { %p258_p1 = pnand %p256_p0, %p246_p13 }
  0x17   : > { %p259_p2 = pneg %p258_p1 }
  0x19   : > { %p266_p7 = pnand %p265_p6, %p259_p2 }
  0x1b   : > { %269 = shalt.err (!%p266_p7)
}
  0x1c   : > { %203 = dma.hbm_to_vmem [thread:$0]  (!%p201_p12), %s448_s0, 128, %s81_s20, [#allocation3]  }
  0x1d   : > { %93 = sbr.rel (%p397_p10) target bundleno = 60 (0x3c), region = 24 }
  0x22   : > { %313 = dma.done.wait (%p208_p9), [#allocation3], 128  }
  0x23   : > { %315 = vsyncadd (%p208_p9), [#allocation3], 4294967168  ;;  %s105_s24 = sand.u32 1, %s326_s7   ;;  %s191_s28 = sshll.u32 %s369_s10, 7  ;;  %v108_v0 = vld [vmem:[#allocation2] sm:$0xff] }
  0x24   : > { %s189_s25 = sshll.u32 %s105_s24, 3  ;;  %v109_v1 = vadd.f32 1.0, %v108_v0  ;;  %s123_s2 = scalar_lea.hbm %s449_s1, %s191_s28 }
  0x25   : > { %s107_s26 = scalar_lea.vmem [#allocation5], %s189_s25  ;;  %s112_s3 = scalar_lea.sflag [#allocation4], %s105_s24 }
  0x26   : > { %s125_s27 = sshll.u32 %s107_s26, 4  ;;  %110 = vst [vmem:[%s107_s26] sm:$0xff] %v109_v1  ;;  %s337_s5 = smov [#allocation5]   ;;  %s126_s27 = int_to_ptr.vmem [resolvable:$true] %s125_s27 }
  0x27   : > { %s270_s4 = scalar_lea.vmem %s126_s27, 128  ;;  %s274_s11 = sshll.u32 %s337_s5, 4  ;;  %s275_s11 = int_to_ptr.vmem [resolvable:$false] %s274_s11 }
  0x28   : > { %p271_p6 = scmp.ne.s32.totalorder %s126_s27, %s270_s4  ;;  %s276_s13 = scalar_lea.vmem %s275_s11, 256 }
  0x29   : > { %p277_p10 = scmp.lt.s32.totalorder %s126_s27, %s275_s11  ;;  %p278_p11 = scmp.lt.s32.totalorder %s276_s13, %s270_s4 }
  0x2a   : > { %p272_p8 = pnand %p271_p6, %p386_p5 }
  0x2b   : > { %p279_p12 = por %p278_p11, %p277_p10 }
  0x2c   : > { %p273_p9 = pneg %p272_p8 }
  0x2e   : > { %p280_p13 = pnand %p279_p12, %p273_p9 }
  0x30   : > { %283 = shalt.err (!%p280_p13)
}
  0x31   : > { %s284_s10 = scalar_lea.hbm %s123_s2, 128  ;;  %s288_s19 = scalar_lea.hbm %s449_s1, 256 }
  0x32   : > { %p285_p0 = scmp.ne.s32.totalorder %s123_s2, %s284_s10  ;;  %p289_p3 = scmp.lt.s32.totalorder %s123_s2, %s449_s1 }
  0x33   : > { %p290_p4 = scmp.lt.s32.totalorder %s288_s19, %s284_s10 }
  0x34   : > { %p286_p1 = pnand %p285_p0, %p386_p5 }
  0x35   : > { %p291_p7 = por %p290_p4, %p289_p3 }
  0x36   : > { %p287_p2 = pneg %p286_p1 }
  0x38   : > { %p292_p6 = pnand %p291_p7, %p287_p2 }
  0x3a   : > { %295 = shalt.err (!%p292_p6)
}
  0x3b   : > { %198 = dma.vmem_to_hbm [thread:$0]  (%p386_p5), %s126_s27, 128, %s123_s2, %s112_s3  }
  0x3c PF: > { %p210_p8 = scmp.ge.s32.totalorder %s334_s9, 2  ;;  %s137_s22 = sand.u32 1, %s322_s6  }
  0x3d   : > { %p453_p9 = scmp.ne.s32.totalorder %s451_s17, 0  ;;  %s138_s23 = scalar_lea.sflag [#allocation4], %s137_s22 }
  0x3f   : > { %p205_p10 = pnand %p210_p8, %p453_p9 }
  0x41   : > { %p206_p11 = pneg %p205_p10 }
  0x43   : > { %317 = dma.done.wait (%p206_p11), %s138_s23, 128  }
  0x44   : > { %319 = vsyncadd (%p206_p11), %s138_s23, 4294967168  ;;  %p12_p12 = scmp.ge.s32.totalorder %s373_s12, 4   ;;  %s454_s6 = smov %s326_s7 }
  0x45   : > { %s455_s7 = smov %s330_s8  ;;  %s456_s8 = smov %s384_s15 }
  0x46   : > { %s457_s9 = smov %s373_s12  ;;  %14 = sbr.rel (!%p12_p12) target bundleno = 4 (0x4), region = 61 }
  0x4b   :  { %143 = vsyncpa [#allocation3], 1 }
  0x4c   :  { %145 = vsyncpa [#allocation3 + $0x1], 1 }
  0x4d   :  { %146 = vsyncpa [#allocation4], 1 }
  0x4e   :  { %148 = vsyncpa [#allocation4 + $0x1], 1 }

// kernel: forward.1
= control target key start
LH: loop header
LB: loop body
LE: loop exit
PB: predicated region body
PF: predicated region fallthrough
CT: control target
= control target key end

     0   :  { %10 = vsyncpa [#allocation3], 0  ;;  %s500_s0 = inlined_call_operand.hbm [shape: f32[8,32], index: 0, kind: input, shape index: {}]   ;;  %s501_s1 = inlined_call_operand.hbm [shape: f32[32,128], index: 1, kind: input, shape index: {}]   ;;  %s502_s2 = inlined_call_operand.vmem [shape: f32[1,128], index: 2, kind: input, shape index: {}]   ;;  %s503_s3 = inlined_call_operand.hbm [shape: f32[128,128], index: 3, kind: input, shape index: {}]   ;;  %s504_s4 = inlined_call_operand.vmem [shape: f32[1,128], index: 4, kind: input, shape index: {}]   ;;  %s505_s5 = inlined_call_operand.hbm [shape: f32[8,128], index: 5, kind: output, shape index: {}]  }
   0x1   :  { %11 = vsyncpa [#allocation6], 0 }
   0x2   :  { %12 = vsyncpa [#allocation4], 0  ;;  %s422_s18 = smov [#allocation5]  }
   0x3   :  { %s28_s19 = sshll.u32 %s422_s18, 4  ;;  %s29_s19 = int_to_ptr.vmem [resolvable:$true] %s28_s19 }
   0x4   :  { %s344_s20 = scalar_lea.vmem %s29_s19, 512  ;;  %p349_p1 = scmp.lt.s32.totalorder %s29_s19, %s29_s19 }
   0x5   :  { %p345_p0 = scmp.ne.s32.totalorder %s29_s19, %s344_s20  ;;  %p350_p2 = scmp.lt.s32.totalorder %s344_s20, %s344_s20 }
   0x7   :  { %p351_p3 = por %p350_p2, %p349_p1 }
   0x9   :  { %p352_p4 = pnand %p351_p3, %p345_p0 }
   0xb   :  { %355 = shalt.err (!%p352_p4)
}
   0xc   :  { %s423_s21 = smov 128   ;;  %s424_s22 = smov 8  }
   0xd   :  { %34 = dma.hbm_to_vmem [thread:$0]  %s501_s1, 512, %s29_s19, [#allocation6], %s423_s21, %s423_s21, %s424_s22  }
   0xe   :  { %s425_s25 = smov [#allocation2]   ;;  %s426_s27 = smov [#allocation7]  }
   0xf   :  { %s19_s26 = sshll.u32 %s425_s25, 4  ;;  %s42_s28 = sshll.u32 %s426_s27, 4  ;;  %s20_s26 = int_to_ptr.vmem [resolvable:$true] %s19_s26  ;;  %s43_s28 = int_to_ptr.vmem [resolvable:$true] %s42_s28 }
  0x10   :  { %s364_s29 = scalar_lea.vmem %s20_s26, 128  ;;  %p369_p6 = scmp.lt.s32.totalorder %s20_s26, %s20_s26 }
  0x11   :  { %p365_p5 = scmp.ne.s32.totalorder %s20_s26, %s364_s29  ;;  %p370_p7 = scmp.lt.s32.totalorder %s364_s29, %s364_s29 }
  0x13   :  { %p371_p8 = por %p370_p7, %p369_p6 }
  0x15   :  { %p372_p9 = pnand %p371_p8, %p365_p5 }
  0x17   :  { %375 = shalt.err (!%p372_p9)
}
  0x18   :  { %22 = dma.hbm_to_vmem [thread:$0]  %s500_s0, 128, %s20_s26, [#allocation3]  }
  0x19   :  { %s384_s7 = scalar_lea.vmem %s43_s28, 2048  ;;  %p389_p11 = scmp.lt.s32.totalorder %s43_s28, %s43_s28 }
  0x1a   :  { %p385_p10 = scmp.ne.s32.totalorder %s43_s28, %s384_s7  ;;  %p390_p12 = scmp.lt.s32.totalorder %s384_s7, %s384_s7 }
  0x1c   :  { %p391_p13 = por %p390_p12, %p389_p11 }
  0x1e   :  { %p392_p0 = pnand %p391_p13, %p385_p10 }
  0x20   :  { %395 = shalt.err (!%p392_p0)
}
  0x21   :  { %48 = dma.hbm_to_vmem [thread:$0]  %s503_s3, 2048, %s43_s28, [#allocation6], %s423_s21, %s423_s21, %s424_s22  }
  0x22   :  { %416 = dma.done.wait [#allocation3], 128  }
  0x23   :  { %417 = vsyncadd [#allocation3], 4294967168 }
  0x24   :  { %418 = dma.done.wait [#allocation6], 2560  }
  0x25   :  { %419 = vsyncadd [#allocation6], 4294964736  ;;  %v427_v0 = vmov 0.0   ;;  %vm428_vm0 = vmmov 0   ;;  %v64_v1 = vld [vmem:[#allocation5 + $0x18] sm:$0xff]  ;;  %v63_v2 = vld [vmem:[#allocation5 + $0x10] sm:$0xff] }
  0x26   :  { %282 = vmatprep.subr.mxu0 %v427_v0  ;;  %290 = vmatprep.mubr.msk.f32.mxu0 %vm428_vm0, %v427_v0  ;;  %v162_v3 = vld [vmem:[#allocation7 + $0x78] sm:$0xff]  ;;  %v62_v4 = vld [vmem:[#allocation5 + $0x8] sm:$0xff]  ;;  %v161_v5 = vld [vmem:[#allocation7 + $0x70] sm:$0xff]  ;;  %vm72_vm1 = vcmask 261120   ;;  %s429_s11 = smov [#allocation8]  }
  0x27   :  { %293 = vmatprep.subr.mxu1 %v427_v0  ;;  %325 = vmatprep.mubr.msk.f32.mxu1 %vm428_vm0, %v427_v0  ;;  %v160_v6 = vld [vmem:[#allocation7 + $0x68] sm:$0xff]  ;;  %v61_v7 = vld [vmem:[#allocation5] sm:$0xff]  ;;  %v60_v8 = vld [vmem:[#allocation2] sm:$0xff]  ;;  %s247_s12 = sshll.u32 %s429_s11, 4  ;;  %s248_s12 = int_to_ptr.vmem [resolvable:$true] %s247_s12 }
  0x28   :  { %283 = vmatpush3.msra.mxu0 %v64_v1  ;;  %294 = vmatpush3.msra.mxu1 %v162_v3  ;;  %v159_v9 = vld [vmem:[#allocation7 + $0x60] sm:$0xff]  ;;  %v158_v10 = vld [vmem:[#allocation7 + $0x58] sm:$0xff]  ;;  %v157_v11 = vld [vmem:[#allocation7 + $0x50] sm:$0xff]  ;;  %s396_s13 = scalar_lea.vmem %s248_s12, 128  ;;  %p401_p2 = scmp.lt.s32.totalorder %s248_s12, %s248_s12 }
  0x29   :  { %284 = vmatprep.subr.mxu0 %v427_v0  ;;  %295 = vmatprep.subr.mxu1 %v427_v0  ;;  %v156_v12 = vld [vmem:[#allocation7 + $0x48] sm:$0xff]  ;;  %v155_v13 = vld [vmem:[#allocation7 + $0x40] sm:$0xff]  ;;  %v154_v14 = vld [vmem:[#allocation7 + $0x38] sm:$0xff]  ;;  %p397_p1 = scmp.ne.s32.totalorder %s248_s12, %s396_s13  ;;  %p402_p3 = scmp.lt.s32.totalorder %s396_s13, %s396_s13 }
  0x2a   :  { %285 = vmatpush3.msra.mxu0 %v63_v2  ;;  %296 = vmatpush3.msra.mxu1 %v161_v5  ;;  %v153_v15 = vld [vmem:[#allocation7 + $0x30] sm:$0xff]  ;;  %v152_v16 = vld [vmem:[#allocation7 + $0x28] sm:$0xff]  ;;  %v151_v17 = vld [vmem:[#allocation7 + $0x20] sm:$0xff] }
  0x2b   :  { %286 = vmatprep.subr.mxu0 %v427_v0  ;;  %297 = vmatprep.subr.mxu1 %v427_v0  ;;  %v150_v18 = vld [vmem:[#allocation7 + $0x18] sm:$0xff]  ;;  %v149_v19 = vld [vmem:[#allocation7 + $0x10] sm:$0xff]  ;;  %v148_v20 = vld [vmem:[#allocation7 + $0x8] sm:$0xff]  ;;  %p403_p4 = por %p402_p3, %p401_p2 }
  0x2c   :  { %287 = vmatpush3.msra.mxu0 %v62_v4  ;;  %298 = vmatpush3.msra.mxu1 %v160_v6  ;;  %v147_v21 = vld [vmem:[#allocation7] sm:$0xff]  ;;  %v257_v22 = vld [vmem:[%s502_s2] ss:$0 sm:$0xff] }
  0x2d   :  { %288 = vmatprep.subr.mxu0 %v427_v0  ;;  %299 = vmatprep.subr.mxu1 %v427_v0  ;;  %v259_v27 = vld [vmem:[%s504_s4] ss:$0 sm:$0xff]  ;;  %p404_p5 = pnand %p403_p4, %p397_p1 }
  0x2e   :  { %289 = vmatpush3.msra.mxu0 %v61_v7  ;;  %300 = vmatpush3.msra.mxu1 %v159_v9 }
  0x2f   :  { %291 = vmatmul.mubr.msk.f32.vlgmr.msra.gmra.mxu0 %vm72_vm1, %v60_v8  ;;  %301 = vmatprep.subr.mxu1 %v427_v0 }
  0x30   :  { %302 = vmatpush3.msra.mxu1 %v158_v10 }
  0x31   :  { %303 = vmatprep.subr.mxu1 %v427_v0 }
  0x32   :  { %304 = vmatpush3.msra.mxu1 %v157_v11 }
  0x33   :  { %305 = vmatprep.subr.mxu1 %v427_v0 }
  0x34   :  { %306 = vmatpush3.msra.mxu1 %v156_v12 }
  0x35   :  { %307 = vmatprep.subr.mxu1 %v427_v0 }
  0x36   :  { %308 = vmatpush3.msra.mxu1 %v155_v13 }
  0x37   :  { %309 = vmatprep.subr.mxu1 %v427_v0 }
  0x38   :  { %310 = vmatpush3.msra.mxu1 %v154_v14 }
  0x39   :  { %311 = vmatprep.subr.mxu1 %v427_v0 }
  0x3a   :  { %312 = vmatpush3.msra.mxu1 %v153_v15 }
  0x3b   :  { %313 = vmatprep.subr.mxu1 %v427_v0 }
  0x3c   :  { %314 = vmatpush3.msra.mxu1 %v152_v16 }
  0x3d   :  { %315 = vmatprep.subr.mxu1 %v427_v0 }
  0x3e   :  { %316 = vmatpush3.msra.mxu1 %v151_v17 }
  0x3f   :  { %317 = vmatprep.subr.mxu1 %v427_v0 }
  0x40   :  { %318 = vmatpush3.msra.mxu1 %v150_v18 }
  0x41   :  { %319 = vmatprep.subr.mxu1 %v427_v0 }
  0x42   :  { %320 = vmatpush3.msra.mxu1 %v149_v19 }
  0x43   :  { %321 = vmatprep.subr.mxu1 %v427_v0 }
  0x44   :  { %322 = vmatpush3.msra.mxu1 %v148_v20 }
  0x45   :  { %323 = vmatprep.subr.mxu1 %v427_v0 }
  0x46   :  { %324 = vmatpush3.msra.mxu1 %v147_v21 }
  0xef   :  { %v142_v23 = vpop.f32.mrf.mxu0 }
  0xf0   :  { %v143_v24 = vadd.f32 %v257_v22, %v142_v23 }
  0xf1   :  { %v292_v25 = vpop.f32.mrf.mxu0 }
  0xf2   :  { %v146_v26 = vmax.f32 %v143_v24, 0.0 }
  0xf4   :  { %326 = vmatmul.mubr.f32.vlgmr.msra.gmra.mxu1 %v146_v26 }
 0x1b4   :  { %v236_v28 = vpop.f32.mrf.mxu1 }
 0x1b5   :  { %v237_v29 = vadd.f32 %v259_v27, %v236_v28 }
 0x1b6   :  { %v327_v30 = vpop.f32.mrf.mxu1 }
 0x1b7   :  { %240 = vst [vmem:[#allocation8] sm:$0xff] %v237_v29 }
 0x1b8   :  { %407 = shalt.err (!%p404_p5)
}
 0x1b9   :  { %250 = dma.vmem_to_hbm [thread:$0]  %s248_s12, 128, %s505_s5, [#allocation4]  }
 0x1ba   :  { %420 = dma.done.wait [#allocation4], 128  }
 0x1bb   :  { %421 = vsyncadd [#allocation4], 4294967168 }
 0x1bc   :  { %254 = vsyncpa [#allocation3], 1 }
 0x1bd   :  { %255 = vsyncpa [#allocation6], 1 }
 0x1be   :  { %256 = vsyncpa [#allocation4], 1 }

</bundles_post_ra>
